<compile_context>
chip_gen: v7x
topology: tpu7x:2x2x1
jax: 0.10.0
libtpu: 0.0.40
codegen_flags: <defaults>
</compile_context>

<pallas_src>
import jax
import jax.numpy as jnp
from jax.experimental import pallas as pl
from jax.experimental.pallas import tpu as pltpu


def _attention_fusion_kernel(x_ref, w1_ref, b1_ref, w2_ref, b2_ref,
                             fused_ref, w_out_ref):
    # x_ref:  (V, TB, D)   one tile of TB batch rows, all views
    # w1_ref: (D, H), b1_ref: (1, H), w2_ref: (1, H), b2_ref: (1, 1) in SMEM
    # fused_ref: (TB, D), w_out_ref: (TB, V)
    V, TB, D = x_ref.shape
    H = w1_ref.shape[1]

    w1 = w1_ref[...]                               # native dtype -> MXU
    b1 = b1_ref[...].astype(jnp.float32)           # (1, H)
    w2 = w2_ref[...].astype(jnp.float32)           # (1, H)
    b2 = b2_ref[0, 0].astype(jnp.float32)          # scalar from SMEM

    # --- Layer 1: one fused MXU matmul over all views -----------------------
    # (V, TB, D) -> (V*TB, D) is a sublane-only merge (layout-free).
    x_all = x_ref[...].reshape(V * TB, D)
    h = jnp.dot(x_all, w1, preferred_element_type=jnp.float32)   # (V*TB, H) f32
    h = jnp.maximum(h + b1, 0.0)

    # --- Layer 2 (H -> 1) on the VPU + XLU lane-reduce ----------------------
    score_cols = []
    for v in range(V):                              # V static slices of h
        hv = h[v * TB:(v + 1) * TB, :]              # (TB, H)
        score_cols.append(jnp.sum(hv * w2, axis=-1, keepdims=True))  # (TB, 1)
    scores = jnp.concatenate(score_cols, axis=-1) + b2            # (TB, V)

    # --- Numerically stable softmax over views on one dense (TB, V) slab ----
    m = jnp.max(scores, axis=-1, keepdims=True)
    e = jnp.exp(scores - m)
    denom = jnp.sum(e, axis=-1, keepdims=True)
    weights = e * pl.reciprocal(denom, approx=True)               # (TB, V)

    w_out_ref[...] = weights.astype(w_out_ref.dtype)

    # --- Weighted sum over views (re-read x from VMEM, f32 accumulate) ------
    acc = x_ref[0].astype(jnp.float32) * weights[:, 0:1]
    for v in range(1, V):
        acc = acc + x_ref[v].astype(jnp.float32) * weights[:, v:v + 1]
    fused_ref[...] = acc.astype(fused_ref.dtype)


def _round_up(x: int, m: int) -> int:
    return ((x + m - 1) // m) * m


def _pick_tb(B: int, V: int, D: int, H: int, itemsize: int) -> int:
    """Batch-tile size: VMEM-budgeted, sublane-aligned, >=2 grid steps when possible."""
    if B <= 32:
        return B  # single tile; block dims equal full array dims
    # Budget for double-buffered input/output blocks + f32 intermediates,
    # conservative enough for v7x's 64 MiB VMEM (target ~20 MiB of blocks).
    budget = 20 << 20
    per_row = (2 * V * D * itemsize            # double-buffered x block
               + 2 * (D + V) * itemsize        # double-buffered outputs
               + 4 * (V * H + D + V))          # f32 h / acc / scores rows
    tb_cap = max(8, (budget // max(per_row, 1)) // 8 * 8)
    # At least 2 grid steps so the "parallel" batch axis can use both v7x TCs.
    tb_half = _round_up(-(-B // 2), 8)
    return max(8, min(1024, tb_cap, tb_half))


def attention_fusion(view_features: jax.Array,
                     w1: jax.Array, b1: jax.Array,
                     w2: jax.Array, b2: jax.Array,
                     *, tb: int | None = None):
    """Attention-based fusion.

    Args:
      view_features: [B, V, D]
      w1: [D, H], b1: [H]   (first Linear, H = D // 2)
      w2: [H],    b2: []    (second Linear -> scalar score)
    Returns:
      (fused [B, D], attention_weights [B, V])
    """
    B, V, D = view_features.shape
    H = w1.shape[1]
    itemsize = jnp.dtype(view_features.dtype).itemsize

    if tb is None:
        tb = _pick_tb(B, V, D, H, itemsize)

    # (V, B, D): tiled trailing dims become a dense (TB, D) slab per view.
    xt = jnp.transpose(view_features, (1, 0, 2))
    b1_2d = b1.reshape(1, H)
    w2_2d = w2.reshape(1, H)
    b2_2d = jnp.reshape(b2, (1, 1))

    grid = (pl.cdiv(B, tb),)

    # Explicit VMEM limit derived from the chosen tile (v7x default is 32 MiB).
    est = ((2 * V * tb * D + 2 * tb * (D + V)) * itemsize
           + 4 * (V * tb * H + tb * D + tb * V + D * H + 2 * H + 2))
    vmem_limit = int(min(48 << 20, max(32 << 20, 2 * est)))

    fused, weights = pl.pallas_call(
        _attention_fusion_kernel,
        out_shape=(
            jax.ShapeDtypeStruct((B, D), view_features.dtype),
            jax.ShapeDtypeStruct((B, V), view_features.dtype),
        ),
        grid_spec=pltpu.PrefetchScalarGridSpec(
            num_scalar_prefetch=0,
            grid=grid,
            in_specs=[
                pl.BlockSpec((V, tb, D), lambda i: (0, i, 0)),
                pl.BlockSpec((D, H), lambda i: (0, 0)),
                pl.BlockSpec((1, H), lambda i: (0, 0)),
                pl.BlockSpec((1, H), lambda i: (0, 0)),
                pl.BlockSpec(memory_space=pltpu.MemorySpace.SMEM),
            ],
            out_specs=[
                pl.BlockSpec((tb, D), lambda i: (i, 0)),
                pl.BlockSpec((tb, V), lambda i: (i, 0)),
            ],
        ),
        compiler_params=pltpu.CompilerParams(
            dimension_semantics=("parallel",),
            vmem_limit_bytes=vmem_limit,
        ),
    )(xt, w1, b1_2d, w2_2d, b2_2d)
    return fused, weights


if __name__ == "__main__":
    key = jax.random.PRNGKey(0)
    batch, num_views, feature_dim = 2, 4, 32
    hidden = feature_dim // 2

    k_x, k_w1, k_b1, k_w2, k_b2 = jax.random.split(key, 5)
    view_features = jax.random.normal(
        k_x, (batch, num_views, feature_dim), dtype=jnp.float32)
    w1 = jax.random.normal(k_w1, (feature_dim, hidden), dtype=jnp.float32) * 0.1
    b1 = jax.random.normal(k_b1, (hidden,), dtype=jnp.float32) * 0.1
    w2 = jax.random.normal(k_w2, (hidden,), dtype=jnp.float32) * 0.1
    b2 = jax.random.normal(k_b2, (), dtype=jnp.float32) * 0.1

    fused, attn_w = attention_fusion(view_features, w1, b1, w2, b2)
    jax.block_until_ready((fused, attn_w))

    # Pure-JAX reference.
    flat = view_features.reshape(-1, feature_dim)
    h = jnp.maximum(flat @ w1 + b1, 0.0)
    scores = (h @ w2.reshape(hidden, 1) + b2).reshape(batch, num_views)
    ref_w = jax.nn.softmax(scores, axis=1)
    ref_fused = jnp.sum(view_features * ref_w[..., None], axis=1)

    assert fused.shape == (batch, feature_dim)
    assert attn_w.shape == (batch, num_views)
    # Tolerances account for the approx-reciprocal softmax normalizer (EUP).
    assert jnp.allclose(attn_w, ref_w, atol=2e-3, rtol=2e-3)
    assert jnp.allclose(fused, ref_fused, atol=2e-3, rtol=2e-3)

    print("KERNEL_OK")
</pallas_src>

<mosaic_0001>
module attributes {stable_mosaic.version = 11 : i64} {
  func.func @_attention_fusion_kernel(%arg0: i32, %arg1: memref<4x2x32xf32, #tpu.memory_space<vmem>>, %arg2: memref<32x16xf32, #tpu.memory_space<vmem>>, %arg3: memref<1x16xf32, #tpu.memory_space<vmem>>, %arg4: memref<1x16xf32, #tpu.memory_space<vmem>>, %arg5: memref<1x1xf32, #tpu.memory_space<smem>>, %arg6: memref<2x32xf32, #tpu.memory_space<vmem>>, %arg7: memref<2x4xf32, #tpu.memory_space<vmem>>) attributes {dimension_semantics = [#tpu.dimension_semantics<parallel>], iteration_bounds = array<i64: 1>, scalar_prefetch = 0 : i64, scratch_operands = 0 : i64, tpu.core_type = #tpu.core_type<tc>, window_params = [{transform_indices = @transform_0, window_bounds = array<i64: 4, 2, 32>}, {pipeline_mode = #tpu.pipeline_mode<synchronous>, transform_indices = @transform_1, window_bounds = array<i64: 32, 16>}, {pipeline_mode = #tpu.pipeline_mode<synchronous>, transform_indices = @transform_2, window_bounds = array<i64: 1, 16>}, {pipeline_mode = #tpu.pipeline_mode<synchronous>, transform_indices = @transform_3, window_bounds = array<i64: 1, 16>}, {transform_indices = @transform_4, window_bounds = array<i64: 1, 1>}, {transform_indices = @transform_5, window_bounds = array<i64: 2, 32>}, {transform_indices = @transform_6, window_bounds = array<i64: 2, 4>}]} {
    %c0 = arith.constant 0 : index
    %c0_0 = arith.constant 0 : index
    %0 = vector.load %arg2[%c0, %c0_0] : memref<32x16xf32, #tpu.memory_space<vmem>>, vector<32x16xf32>
    %c0_1 = arith.constant 0 : index
    %c0_2 = arith.constant 0 : index
    %1 = vector.load %arg3[%c0_1, %c0_2] : memref<1x16xf32, #tpu.memory_space<vmem>>, vector<1x16xf32>
    %c0_3 = arith.constant 0 : index
    %c0_4 = arith.constant 0 : index
    %2 = vector.load %arg4[%c0_3, %c0_4] : memref<1x16xf32, #tpu.memory_space<vmem>>, vector<1x16xf32>
    %c0_5 = arith.constant 0 : index
    %c0_6 = arith.constant 0 : index
    %3 = memref.load %arg5[%c0_5, %c0_6] : memref<1x1xf32, #tpu.memory_space<smem>>
    %c0_7 = arith.constant 0 : index
    %c0_8 = arith.constant 0 : index
    %c0_9 = arith.constant 0 : index
    %4 = vector.load %arg1[%c0_7, %c0_8, %c0_9] : memref<4x2x32xf32, #tpu.memory_space<vmem>>, vector<4x2x32xf32>
    %5 = vector.shape_cast %4 : vector<4x2x32xf32> to vector<8x32xf32>
    %cst = arith.constant dense<0.000000e+00> : vector<8x16xf32>
    %6 = tpu.matmul %5, %0, %cst {dimension_numbers = #tpu.dot_dimension_numbers<[1], [0], [0], [1], [0, 0, 1, 1], [], []>} : vector<8x32xf32>, vector<32x16xf32>, vector<8x16xf32> -> vector<8x16xf32>
    %7 = vector.broadcast %1 : vector<1x16xf32> to vector<8x16xf32>
    %8 = arith.addf %6, %7 : vector<8x16xf32>
    %cst_10 = arith.constant 0.000000e+00 : f32
    %9 = vector.broadcast %cst_10 : f32 to vector<8x16xf32>
    %10 = arith.maximumf %8, %9 : vector<8x16xf32>
    %11 = vector.extract_strided_slice %10 {offsets = [0, 0], sizes = [2, 16], strides = [1, 1]} : vector<8x16xf32> to vector<2x16xf32>
    %12 = vector.broadcast %2 : vector<1x16xf32> to vector<2x16xf32>
    %13 = arith.mulf %11, %12 : vector<2x16xf32>
    %cst_11 = arith.constant dense<0.000000e+00> : vector<2xf32>
    %14 = vector.multi_reduction <add>, %13, %cst_11 [1] : vector<2x16xf32> to vector<2xf32>
    %15 = vector.shape_cast %14 : vector<2xf32> to vector<2x1xf32>
    %16 = vector.extract_strided_slice %10 {offsets = [2, 0], sizes = [2, 16], strides = [1, 1]} : vector<8x16xf32> to vector<2x16xf32>
    %17 = vector.broadcast %2 : vector<1x16xf32> to vector<2x16xf32>
    %18 = arith.mulf %16, %17 : vector<2x16xf32>
    %cst_12 = arith.constant dense<0.000000e+00> : vector<2xf32>
    %19 = vector.multi_reduction <add>, %18, %cst_12 [1] : vector<2x16xf32> to vector<2xf32>
    %20 = vector.shape_cast %19 : vector<2xf32> to vector<2x1xf32>
    %21 = vector.extract_strided_slice %10 {offsets = [4, 0], sizes = [2, 16], strides = [1, 1]} : vector<8x16xf32> to vector<2x16xf32>
    %22 = vector.broadcast %2 : vector<1x16xf32> to vector<2x16xf32>
    %23 = arith.mulf %21, %22 : vector<2x16xf32>
    %cst_13 = arith.constant dense<0.000000e+00> : vector<2xf32>
    %24 = vector.multi_reduction <add>, %23, %cst_13 [1] : vector<2x16xf32> to vector<2xf32>
    %25 = vector.shape_cast %24 : vector<2xf32> to vector<2x1xf32>
    %26 = vector.extract_strided_slice %10 {offsets = [6, 0], sizes = [2, 16], strides = [1, 1]} : vector<8x16xf32> to vector<2x16xf32>
    %27 = vector.broadcast %2 : vector<1x16xf32> to vector<2x16xf32>
    %28 = arith.mulf %26, %27 : vector<2x16xf32>
    %cst_14 = arith.constant dense<0.000000e+00> : vector<2xf32>
    %29 = vector.multi_reduction <add>, %28, %cst_14 [1] : vector<2x16xf32> to vector<2xf32>
    %30 = vector.shape_cast %29 : vector<2xf32> to vector<2x1xf32>
    %31 = tpu.concatenate %15, %20, %25, %30 in 1 : vector<2x1xf32>, vector<2x1xf32>, vector<2x1xf32>, vector<2x1xf32> -> vector<2x4xf32>
    %32 = vector.broadcast %3 : f32 to vector<2x4xf32>
    %33 = arith.addf %31, %32 : vector<2x4xf32>
    %cst_15 = arith.constant dense<0xFF800000> : vector<2xf32>
    %34 = vector.multi_reduction <maximumf>, %33, %cst_15 [1] : vector<2x4xf32> to vector<2xf32>
    %35 = vector.shape_cast %34 : vector<2xf32> to vector<2x1xf32>
    %36 = vector.broadcast %35 : vector<2x1xf32> to vector<2x4xf32>
    %37 = arith.subf %33, %36 : vector<2x4xf32>
    %38 = math.exp %37 : vector<2x4xf32>
    %cst_16 = arith.constant dense<0.000000e+00> : vector<2xf32>
    %39 = vector.multi_reduction <add>, %38, %cst_16 [1] : vector<2x4xf32> to vector<2xf32>
    %40 = vector.shape_cast %39 : vector<2xf32> to vector<2x1xf32>
    %41 = tpu.reciprocal %40 {approx = true} : vector<2x1xf32> -> vector<2x1xf32>
    %42 = vector.broadcast %41 : vector<2x1xf32> to vector<2x4xf32>
    %43 = arith.mulf %38, %42 : vector<2x4xf32>
    %c0_17 = arith.constant 0 : index
    %c0_18 = arith.constant 0 : index
    %44 = vector.load %arg7[%c0_17, %c0_18] : memref<2x4xf32, #tpu.memory_space<vmem>>, vector<2x4xf32>
    tpu.vector_store %arg7[%c0_17, %c0_18], %43 {strides = array<i32>} : memref<2x4xf32, #tpu.memory_space<vmem>>, vector<2x4xf32>,
    %c0_19 = arith.constant 0 : index
    %c0_20 = arith.constant 0 : index
    %c0_21 = arith.constant 0 : index
    %45 = vector.load %arg1[%c0_19, %c0_20, %c0_21] : memref<4x2x32xf32, #tpu.memory_space<vmem>>, vector<1x2x32xf32>
    %46 = vector.shape_cast %45 : vector<1x2x32xf32> to vector<2x32xf32>
    %47 = vector.extract_strided_slice %43 {offsets = [0, 0], sizes = [2, 1], strides = [1, 1]} : vector<2x4xf32> to vector<2x1xf32>
    %48 = vector.broadcast %47 : vector<2x1xf32> to vector<2x32xf32>
    %49 = arith.mulf %46, %48 : vector<2x32xf32>
    %c1 = arith.constant 1 : index
    %c0_22 = arith.constant 0 : index
    %c0_23 = arith.constant 0 : index
    %50 = vector.load %arg1[%c1, %c0_22, %c0_23] : memref<4x2x32xf32, #tpu.memory_space<vmem>>, vector<1x2x32xf32>
    %51 = vector.shape_cast %50 : vector<1x2x32xf32> to vector<2x32xf32>
    %52 = vector.extract_strided_slice %43 {offsets = [0, 1], sizes = [2, 1], strides = [1, 1]} : vector<2x4xf32> to vector<2x1xf32>
    %53 = vector.broadcast %52 : vector<2x1xf32> to vector<2x32xf32>
    %54 = arith.mulf %51, %53 : vector<2x32xf32>
    %55 = arith.addf %49, %54 : vector<2x32xf32>
    %c2 = arith.constant 2 : index
    %c0_24 = arith.constant 0 : index
    %c0_25 = arith.constant 0 : index
    %56 = vector.load %arg1[%c2, %c0_24, %c0_25] : memref<4x2x32xf32, #tpu.memory_space<vmem>>, vector<1x2x32xf32>
    %57 = vector.shape_cast %56 : vector<1x2x32xf32> to vector<2x32xf32>
    %58 = vector.extract_strided_slice %43 {offsets = [0, 2], sizes = [2, 1], strides = [1, 1]} : vector<2x4xf32> to vector<2x1xf32>
    %59 = vector.broadcast %58 : vector<2x1xf32> to vector<2x32xf32>
    %60 = arith.mulf %57, %59 : vector<2x32xf32>
    %61 = arith.addf %55, %60 : vector<2x32xf32>
    %c3 = arith.constant 3 : index
    %c0_26 = arith.constant 0 : index
    %c0_27 = arith.constant 0 : index
    %62 = vector.load %arg1[%c3, %c0_26, %c0_27] : memref<4x2x32xf32, #tpu.memory_space<vmem>>, vector<1x2x32xf32>
    %63 = vector.shape_cast %62 : vector<1x2x32xf32> to vector<2x32xf32>
    %64 = vector.extract_strided_slice %43 {offsets = [0, 3], sizes = [2, 1], strides = [1, 1]} : vector<2x4xf32> to vector<2x1xf32>
    %65 = vector.broadcast %64 : vector<2x1xf32> to vector<2x32xf32>
    %66 = arith.mulf %63, %65 : vector<2x32xf32>
    %67 = arith.addf %61, %66 : vector<2x32xf32>
    %c0_28 = arith.constant 0 : index
    %c0_29 = arith.constant 0 : index
    %68 = vector.load %arg6[%c0_28, %c0_29] : memref<2x32xf32, #tpu.memory_space<vmem>>, vector<2x32xf32>
    tpu.vector_store %arg6[%c0_28, %c0_29], %67 {strides = array<i32>} : memref<2x32xf32, #tpu.memory_space<vmem>>, vector<2x32xf32>,
    return
  }
  func.func @transform_0(%arg0: i32) -> (i32, i32, i32) {
    %c0_i32 = arith.constant 0 : i32
    %c0_i32_0 = arith.constant 0 : i32
    %c0_i32_1 = arith.constant 0 : i32
    return %c0_i32, %arg0, %c0_i32_0 : i32, i32, i32
  }
  func.func @transform_1(%arg0: i32) -> (i32, i32) {
    %c0_i32 = arith.constant 0 : i32
    %c0_i32_0 = arith.constant 0 : i32
    %c0_i32_1 = arith.constant 0 : i32
    return %c0_i32, %c0_i32_0 : i32, i32
  }
  func.func @transform_2(%arg0: i32) -> (i32, i32) {
    %c0_i32 = arith.constant 0 : i32
    %c0_i32_0 = arith.constant 0 : i32
    %c0_i32_1 = arith.constant 0 : i32
    return %c0_i32, %c0_i32_0 : i32, i32
  }
  func.func @transform_3(%arg0: i32) -> (i32, i32) {
    %c0_i32 = arith.constant 0 : i32
    %c0_i32_0 = arith.constant 0 : i32
    %c0_i32_1 = arith.constant 0 : i32
    return %c0_i32, %c0_i32_0 : i32, i32
  }
  func.func @transform_4(%arg0: i32) -> (i32, i32) {
    %c0_i32 = arith.constant 0 : i32
    %c0_i32_0 = arith.constant 0 : i32
    %c0_i32_1 = arith.constant 0 : i32
    return %c0_i32, %c0_i32_0 : i32, i32
  }
  func.func @transform_5(%arg0: i32) -> (i32, i32) {
    %c0_i32 = arith.constant 0 : i32
    %c0_i32_0 = arith.constant 0 : i32
    return %arg0, %c0_i32 : i32, i32
  }
  func.func @transform_6(%arg0: i32) -> (i32, i32) {
    %c0_i32 = arith.constant 0 : i32
    %c0_i32_0 = arith.constant 0 : i32
    return %arg0, %c0_i32 : i32, i32
  }
}

</mosaic_0001>

<bundles_post_ra>
// kernel: tpu_custom_call.1
= control target key start
LH: loop header
LB: loop body
LE: loop exit
PB: predicated region body
PF: predicated region fallthrough
CT: control target
= control target key end

     0   :  { %13 = vsyncpa [#allocation4], 0  ;;  %v51_v3 = vlaneseq  ;;  %v346_v4 = vmov 0.0|0.0   ;;  %vm347_vm0 = vmmov 0   ;;  %v348_v7 = vmov 0.0   ;;  %s463_s0 = inlined_call_operand.vmem [shape: f32[4,2,32], index: 0, kind: input, shape index: {}]   ;;  %s464_s1 = inlined_call_operand.vmem [shape: f32[32,16], index: 1, kind: input, shape index: {}]   ;;  %s465_s2 = inlined_call_operand.vmem [shape: f32[1,16], index: 2, kind: input, shape index: {}]   ;;  %s466_s3 = inlined_call_operand.vmem [shape: f32[1,16], index: 3, kind: input, shape index: {}]   ;;  %s467_s4 = inlined_call_operand.<no memory space> [shape: f32[1,1], index: 4, kind: input, shape index: {}]   ;;  %s468_s5 = inlined_call_operand.hbm [shape: f32[2,32], index: 5, kind: output, shape index: {0}]   ;;  %s469_s6 = inlined_call_operand.hbm [shape: f32[2,4], index: 6, kind: output, shape index: {1}]  }
   0x1   :  { %v25_v0 = vld [vmem:[%s464_s1] sm:$0xff]  ;;  %v26_v1 = vld [vmem:[%s464_s1 + $0x8] sm:$0xff]  ;;  %v27_v2 = vld [vmem:[%s464_s1 + $0x10] sm:$0xff]  ;;  %273 = vmatprep.subr.bf16.mxu0 %v346_v4  ;;  %270 = vmatprep.mubr.msk.f32.mxu0 %vm347_vm0, %v348_v7  ;;  %v349_v13 = vmov 1983009808  }
   0x2   :  { %v274_v5 = vpack.c.bf16 %v26_v1, %v25_v0  ;;  %v28_v6 = vld [vmem:[%s464_s1 + $0x18] sm:$0xff]  ;;  %v32_v8 = vld [vmem:[%s463_s0] sm:$0x3]  ;;  %v33_v9 = vld [vmem:[%s463_s0 + $0x2] sm:$0x3]  ;;  %v49_v14 = vunpack.c.l.s4 %v349_v13  ;;  %v52_v15 = vshrl.u32 %v51_v3, 7 }
   0x3   :  { %v34_v10 = vld [vmem:[%s463_s0 + $0x4] sm:$0x3]  ;;  %v35_v11 = vld [vmem:[%s463_s0 + $0x6] sm:$0x3]  ;;  %v277_v12 = vpack.c.bf16 %v28_v6, %v27_v2 }
   0x4   :  { %275 = vmatpush3.bf16.msra.mxu0 %v274_v5 }
   0x5   :  { %276 = vmatprep.subr.bf16.mxu0 %v346_v4 }
   0x6   :  { %14 = vsyncpa [#allocation6], 0  ;;  %v46_v16 = vcombine.low %v32_v8, %v33_v9  ;;  %v47_v17 = vcombine.low %v34_v10, %v35_v11  ;;  %v50_v18 = vunpack.c.0.s8 %v49_v14  ;;  %vm63_vm1 = vcmask 261120   ;;  %v251_v23 = vld [vmem:[%s465_s2] ss:$0 sm:$0xff] }
   0x7   :  { %v253_v27 = vld [vmem:[%s466_s3] ss:$0 sm:$0xff]  ;;  %vm148_vm2 = vcmask 125954   ;;  %vm144_vm3 = vcmask 123904   ;;  %vm152_vm4 = vcmask 128004   ;;  %vm156_vm5 = vcmask 130054  }
   0x8   :  { %278 = vmatpush3.bf16.msra.mxu0 %v277_v12  ;;  %v53_v19 = vsub.s32 %v50_v18, %v52_v15  ;;  %vm169_vm6 = vcmask 7168   ;;  %vm171_vm7 = vcmask 15360   ;;  %vm173_vm8 = vcmask 23552  }
   0x9   :  { %v175_v42 = vstv %s467_s4  ;;  %vm177_vm9 = vcmask 25600   ;;  %v350_v52 = vmov 1   ;;  %v351_v53 = vmov 0   ;;  %s354_s4 = smov [#allocation5]  }
   0xa   :  { %v54_v20 = vrot.slane %v46_v16, %v53_v19  ;;  %v61_v21 = vrot.slane %v47_v17, %v53_v19  ;;  %290 = vset.pattern.permute.xlu1 %v350_v52  ;;  %289 = vset.pattern.permute.xlu0 %v351_v53  ;;  %v352_v57 = vmov 2   ;;  %v353_v58 = vmov 3   ;;  %s239_s16 = sshll.u32 %s354_s4, 4  ;;  %s240_s16 = int_to_ptr.vmem [resolvable:$true] %s239_s16 }
   0xb   :  { %s298_s17 = scalar_lea.vmem %s240_s16, 32  ;;  %p303_p1 = scmp.lt.s32.totalorder %s240_s16, %s240_s16 }
   0xc   :  { %v62_v22 = vcombine.low %v54_v20, %v61_v21  ;;  %p299_p0 = scmp.ne.s32.totalorder %s240_s16, %s298_s17  ;;  %p304_p2 = scmp.lt.s32.totalorder %s298_s17, %s298_s17 }
   0xe   :  { %271 = vmatmul.mubr.msk.f32.vlgmr.msra.gmra.mrb[0].mxu0 %vm63_vm1, %v62_v22  ;;  %p305_p3 = por %p304_p2, %p303_p1 }
  0x10   :  { %p306_p4 = pnand %p305_p3, %p299_p0 }
  0xe1   :  { %v132_v24 = vpop.f32.mrb[0].mxu0 }
  0xe2   :  { %v133_v25 = vadd.f32 %v251_v23, %v132_v24  ;;  %v272_v26 = vpop.f32.mrb[1].mxu0 }
  0xe4   :  { %v136_v28 = vmax.f32 %v133_v25, 0.0 }
  0xe6   :  { %v143_v29 = vmul.f32 %v253_v27, %v136_v28 }
  0xe8   :  { %v149_v30 = vsel %vm148_vm2, %v143_v29, 0.0  ;;  %v145_v31 = vsel %vm144_vm3, %v143_v29, 0.0  ;;  %v153_v32 = vsel %vm152_vm4, %v143_v29, 0.0  ;;  %v157_v33 = vsel %vm156_vm5, %v143_v29, 0.0 }
  0xe9   :  { %150 = vadd.xlane.f32.xlu0 %v149_v30  ;;  %146 = vadd.xlane.f32.xlu1 %v145_v31 }
  0xed   :  { %154 = vadd.xlane.f32.xlu0 %v153_v32  ;;  %158 = vadd.xlane.f32.xlu1 %v157_v33 }
 0x176   :  { %v151_v34 = vpop.xlane.xlu0 %150  ;;  %v147_v35 = vpop.xlane.xlu1 %146 }
 0x177   :  { %v161_v36 = vrot.slane %v151_v34, 2 }
 0x179   :  { %v170_v41 = vsel %vm169_vm6, %v147_v35, %v161_v36 }
 0x17a   :  { %v155_v37 = vpop.xlane.xlu0 %154  ;;  %v159_v38 = vpop.xlane.xlu1 %158 }
 0x17b   :  { %v164_v39 = vrot.slane %v155_v37, 4  ;;  %v167_v40 = vrot.slane %v159_v38, 6 }
 0x17d   :  { %v172_v43 = vsel %vm171_vm7, %v170_v41, %v164_v39 }
 0x17e   :  { %v174_v44 = vsel %vm173_vm8, %v172_v43, %v167_v40 }
 0x17f   :  { %v176_v45 = vadd.f32 %v175_v42, %v174_v44 }
 0x181   :  { %v178_v46 = vsel %vm177_vm9, %v176_v45, -inf }
 0x182   :  { %179 = vmax.xlane.f32.xlu0 %v178_v46 }
 0x20f   :  { %v180_v47 = vpop.xlane.xlu0 %179 }
 0x210   :  { %v181_v48 = vsub.f32 %v176_v45, %v180_v47 }
 0x212   :  { %v182_v49 = vmul.f32 1.442695, %v181_v48 }
 0x214   :  { %294 = vpow2.f32 %v182_v49 }
 0x21e   :  { %v295_v50 = vpop.eup %294 }
 0x21f   :  { %v184_v51 = vsel %vm177_vm9, %v295_v50, 0.0 }
 0x220   :  { %185 = vadd.xlane.f32.xlu1 %v184_v51 }
 0x2ad   :  { %v186_v54 = vpop.xlane.xlu1 %185 }
 0x2ae   :  { %296 = vrcp.f32 %v186_v54 }
 0x2b8   :  { %v297_v55 = vpop.eup %296 }
 0x2b9   :  { %v188_v56 = vmul.f32 %v297_v55, %v295_v50 }
 0x2bb   :  { %189 = vst.msk [vmem:[#allocation5] sm:$0x3] %vm177_vm9, %v188_v56  ;;  %200 = vperm.xlu1 %290, %v188_v56   ;;  %193 = vperm.xlu0 %289, %v188_v56  }
 0x2bf   :  { %291 = vset.pattern.permute.xlu1 %v352_v57  ;;  %293 = vset.pattern.permute.xlu0 %v353_v58 }
 0x2c0   :  { %208 = vperm.xlu1 %291, %v188_v56  }
 0x2c4   :  { %292 = vset.pattern.permute.xlu1 %v353_v58 }
 0x2c5   :  { %216 = vperm.xlu1 %292, %v188_v56  }
 0x2c6   :  { %309 = shalt.err (!%p306_p4)
}
 0x2c7   :  { %s310_s20 = scalar_lea.hbm %s469_s6, 32 }
 0x2c8   :  { %p311_p5 = scmp.ne.s32.totalorder %s469_s6, %s310_s20  ;;  %p314_p6 = scmp.lt.u32.totalorder %s310_s20, %s469_s6 }
 0x2ca   :  { %p316_p7 = pnand %p314_p6, %p311_p5 }
 0x2cc   :  { %319 = shalt.err (!%p316_p7)
}
 0x2cd   :  { %242 = dma.vmem_to_hbm [thread:$0]  %s240_s16, 32, %s469_s6, [#allocation6]   ;;  %v254_v60 = vld [vmem:[%s463_s0 + $0x2] sm:$0x3]  ;;  %v190_v61 = vld [vmem:[%s463_s0] sm:$0x3] }
 0x2ce   :  { %v255_v63 = vld [vmem:[%s463_s0 + $0x4] sm:$0x3]  ;;  %v256_v4 = vld [vmem:[%s463_s0 + $0x6] sm:$0x3]  ;;  %s355_s10 = smov [#allocation3]   ;;  %vm221_vm10 = vcmask 254976  }
 0x2cf   :  { %s229_s11 = sshll.u32 %s355_s10, 4  ;;  %s230_s11 = int_to_ptr.vmem [resolvable:$true] %s229_s11 }
 0x2d0   :  { %s320_s12 = scalar_lea.vmem %s230_s11, 32  ;;  %p325_p9 = scmp.lt.s32.totalorder %s230_s11, %s230_s11 }
 0x2d1   :  { %p321_p8 = scmp.ne.s32.totalorder %s230_s11, %s320_s12  ;;  %p326_p10 = scmp.lt.s32.totalorder %s320_s12, %s320_s12 }
 0x2d3   :  { %p327_p11 = por %p326_p10, %p325_p9 }
 0x2d5   :  { %p328_p12 = pnand %p327_p11, %p321_p8 }
 0x33a   :  { %v201_v59 = vpop.permute.xlu1 %200  ;;  %v194_v62 = vpop.permute.xlu0 %193 }
 0x33b   :  { %v203_v0 = vmul.f32 %v254_v60, %v201_v59  ;;  %v196_v1 = vmul.f32 %v194_v62, %v190_v61 }
 0x33d   :  { %v204_v5 = vadd.f32 %v203_v0, %v196_v1 }
 0x33f   :  { %v209_v2 = vpop.permute.xlu1 %208 }
 0x340   :  { %v211_v3 = vmul.f32 %v255_v63, %v209_v2 }
 0x342   :  { %v212_v7 = vadd.f32 %v211_v3, %v204_v5 }
 0x344   :  { %v217_v6 = vpop.permute.xlu1 %216 }
 0x345   :  { %v219_v8 = vmul.f32 %v256_v4, %v217_v6 }
 0x347   :  { %v220_v9 = vadd.f32 %v219_v8, %v212_v7 }
 0x349   :  { %222 = vst.msk [vmem:[#allocation3] sm:$0x3] %vm221_vm10, %v220_v9 }
 0x34a   :  { %331 = shalt.err (!%p328_p12)
}
 0x34b   :  { %s332_s0 = scalar_lea.hbm %s468_s5, 32 }
 0x34c   :  { %p333_p13 = scmp.ne.s32.totalorder %s468_s5, %s332_s0  ;;  %p336_p0 = scmp.lt.u32.totalorder %s332_s0, %s468_s5 }
 0x34e   :  { %p338_p1 = pnand %p336_p0, %p333_p13 }
 0x350   :  { %341 = shalt.err (!%p338_p1)
}
 0x351   :  { %232 = dma.vmem_to_hbm [thread:$0]  %s230_s11, 32, %s468_s5, [#allocation4]  }
 0x352   :  { %342 = dma.done.wait [#allocation4], 32  }
 0x353   :  { %343 = vsyncadd [#allocation4], 4294967264 }
 0x354   :  { %344 = dma.done.wait [#allocation6], 32  }
 0x355   :  { %345 = vsyncadd [#allocation6], 4294967264 }
 0x356   :  { %249 = vsyncpa [#allocation4], 1 }
 0x357   :  { %250 = vsyncpa [#allocation6], 1 }

</bundles_post_ra>
